<compile_context>
chip_gen: v5e
topology: v5e:2x2
jax: 0.10.0
libtpu: 0.0.40
codegen_flags: <defaults>
</compile_context>

<pallas_src>
import functools

import numpy as np
import jax
import jax.numpy as jnp
from jax.experimental import pallas as pl
from jax.experimental.pallas import tpu as pltpu


# ----------------------------------------------------------------------------
# Pallas kernel: grid = (row tile rb [parallel], student crop v [arbitrary])
# ----------------------------------------------------------------------------
def _dino_kernel(temps_ref, teacher_ref, student_ref, center_ref,
                 loss_ref, tsum_ref, q_ref):
    v = pl.program_id(1)
    inv_teacher_temp = temps_ref[0]
    inv_student_temp = temps_ref[1]

    @pl.when(v == 0)
    def _teacher_once_per_row_tile():
        # Zero the per-row-tile loss accumulator.
        loss_ref[...] = jnp.zeros_like(loss_ref)
        t_raw = teacher_ref[...].astype(jnp.float32)                 # (2, tb, D)
        # Column sum of raw teacher logits (both crops) for the fused centre EMA.
        tsum_ref[...] = jnp.sum(jnp.sum(t_raw, axis=1, keepdims=True),
                                axis=0, keepdims=True)               # (1, 1, D)
        # Teacher softmax((t - center) / temp) for BOTH crops, cached in VMEM
        # and reused by every student crop of this row tile.
        t = (t_raw - center_ref[...][None]) * inv_teacher_temp
        t = t - jnp.max(t, axis=-1, keepdims=True)
        e = jnp.exp(t)
        q_ref[...] = e * pl.reciprocal(jnp.sum(e, axis=-1, keepdims=True),
                                       approx=False)

    # Student log-softmax pieces: computed ONCE per (row tile, student crop).
    s = student_ref[0].astype(jnp.float32) * inv_student_temp        # (tb, D)
    s = s - jnp.max(s, axis=-1, keepdims=True)
    log_z = jnp.log(jnp.sum(jnp.exp(s), axis=-1, keepdims=True))     # (tb, 1)

    # Folded cross-entropy (sum(q) == 1):
    #   loss_row(iq) = -sum_d q_iq * (s - log_z) = log_z - sum_d q_iq * s
    # Diagonal pairs (v == iq) are skipped at runtime by pl.when.
    @pl.when(v != 0)
    def _pair_with_teacher_crop_0():
        per_row = log_z - jnp.sum(q_ref[0] * s, axis=-1, keepdims=True)  # (tb,1)
        loss_ref[...] += jnp.sum(per_row, axis=0, keepdims=True)[None]   # (1,1,1)

    @pl.when(v != 1)
    def _pair_with_teacher_crop_1():
        per_row = log_z - jnp.sum(q_ref[1] * s, axis=-1, keepdims=True)
        loss_ref[...] += jnp.sum(per_row, axis=0, keepdims=True)[None]


# ----------------------------------------------------------------------------
# jitted wrapper around pallas_call (retraces only on shapes / ncrops / tb)
# ----------------------------------------------------------------------------
@functools.partial(jax.jit, static_argnames=("ncrops", "tb", "vmem_limit"))
def _dino_forward(inv_temps, student_output, teacher_output, center,
                  center_momentum, *, ncrops, tb, vmem_limit):
    D = student_output.shape[1]
    B = teacher_output.shape[0] // 2
    nrb = B // tb

    teacher3 = teacher_output.reshape(2, B, D)        # free reshape (contiguous)
    student3 = student_output.reshape(ncrops, B, D)

    loss_parts, tsum_parts = pl.pallas_call(
        _dino_kernel,
        out_shape=(jax.ShapeDtypeStruct((nrb, 1, 1), jnp.float32),
                   jax.ShapeDtypeStruct((nrb, 1, D), jnp.float32)),
        grid_spec=pltpu.PrefetchScalarGridSpec(
            num_scalar_prefetch=0,
            grid=(nrb, ncrops),
            in_specs=[
                pl.BlockSpec(memory_space=pltpu.MemorySpace.SMEM),       # temps
                # Both teacher crops in one block; index constant across v, so
                # it is DMA'd once per row tile.
                pl.BlockSpec((2, tb, D), lambda rb, v: (0, rb, 0)),
                # Each student crop tile: DMA'd once per row tile.
                # TODO(synk): add pipeline_mode=pl.Buffered(3) here if profiling
                # shows exposed DMA at the v==0 (teacher softmax) boundary.
                pl.BlockSpec((1, tb, D), lambda rb, v: (v, rb, 0)),
                pl.BlockSpec((1, D), lambda rb, v: (0, 0)),              # center
            ],
            out_specs=(
                pl.BlockSpec((1, 1, 1), lambda rb, v: (rb, 0, 0)),   # loss partial
                pl.BlockSpec((1, 1, D), lambda rb, v: (rb, 0, 0)),   # teacher colsum
            ),
            scratch_shapes=[pltpu.VMEM((2, tb, D), jnp.float32)],    # cached q
        ),
        compiler_params=pltpu.CompilerParams(
            dimension_semantics=("parallel", "arbitrary"),
            vmem_limit_bytes=vmem_limit),
    )(inv_temps, teacher3, student3, center)

    n_loss_terms = 2 * (ncrops - 1)
    total_loss = jnp.sum(loss_parts) / jnp.float32(B * n_loss_terms)

    # Centre EMA: tiny (1, D) combine of per-row-tile column sums in plain JAX.
    # TODO(synk): dist.all_reduce is a no-op here (single device, world_size=1).
    batch_center = jnp.sum(tsum_parts, axis=0) / jnp.float32(2 * B)   # (1, D)
    new_center = center * center_momentum + batch_center * (1.0 - center_momentum)
    return total_loss, new_center


# ----------------------------------------------------------------------------
# generation-aware tiling / VMEM budget
# ----------------------------------------------------------------------------
def _vmem_capacity_bytes():
    try:
        return int(pltpu.get_tpu_info().vmem_capacity_bytes)
    except Exception:
        return 64 * 1024 * 1024      # conservative fallback (v7x per-core VMEM)


def _pick_tiling(B, D, in_dtype):
    cap = _vmem_capacity_bytes()
    itemsize = jnp.dtype(in_dtype).itemsize
    sub = 8 if itemsize >= 4 else 16          # sublane packing (f32 vs bf16)
    # Live VMEM is roughly 12-15 (tb, D) f32-tile equivalents (teacher 2-crop
    # block double-buffered, student double-buffered, q cache, elementwise
    # temporaries), so target cap//20 per tile → fits v7x (64 MiB) and lets
    # v5e/v6e (128 MiB) take ~2x larger tiles.
    tile_target = max(sub * D * 4, cap // 20)
    cap_rows = max(sub, (tile_target // (D * 4)) // sub * sub)
    tb, t = sub, sub
    while t <= min(B, cap_rows):
        if B % t == 0:
            tb = t
        t += sub
    vmem_limit = int(cap * 0.75)
    return tb, vmem_limit


# ----------------------------------------------------------------------------
# DINOLoss module-style wrapper
# ----------------------------------------------------------------------------
class DINOLossPallas:
    def __init__(self, out_dim, ncrops, warmup_teacher_temp, teacher_temp,
                 warmup_teacher_temp_epochs, nepochs,
                 student_temp=0.1, center_momentum=0.9):
        self.student_temp = float(student_temp)
        self.center_momentum = float(center_momentum)
        self.ncrops = int(ncrops)
        self.out_dim = int(out_dim)
        self.center = jnp.zeros((1, out_dim), dtype=jnp.float32)
        self.teacher_temp_schedule = np.concatenate((
            np.linspace(warmup_teacher_temp, teacher_temp,
                        warmup_teacher_temp_epochs),
            np.ones(nepochs - warmup_teacher_temp_epochs) * teacher_temp,
        ))

    def __call__(self, student_output, teacher_output, epoch):
        ncrops = self.ncrops
        D = student_output.shape[1]
        assert student_output.shape[0] % ncrops == 0
        B = student_output.shape[0] // ncrops
        assert teacher_output.shape == (2 * B, D)
        sub = 8 if jnp.dtype(student_output.dtype).itemsize >= 4 else 16
        assert B % sub == 0, (
            f"per-crop batch must be a multiple of {sub} for "
            f"{student_output.dtype} sublane tiling")

        temp = float(self.teacher_temp_schedule[epoch])
        # Runtime scalars: no retrace/recompile as the teacher temp warms up.
        inv_temps = jnp.asarray([1.0 / temp, 1.0 / self.student_temp],
                                dtype=jnp.float32)
        tb, vmem_limit = _pick_tiling(B, D, student_output.dtype)

        total_loss, new_center = _dino_forward(
            inv_temps, student_output, teacher_output, self.center,
            self.center_momentum, ncrops=ncrops, tb=tb, vmem_limit=vmem_limit)
        self.center = new_center
        return total_loss


# ----------------------------------------------------------------------------
# pure-JAX reference (mirrors the PyTorch forward exactly)
# ----------------------------------------------------------------------------
def reference_dino_loss(student_output, teacher_output, center, temp,
                        student_temp, ncrops):
    student_out = student_output.astype(jnp.float32) / student_temp
    student_chunks = jnp.split(student_out, ncrops, axis=0)
    teacher_soft = jax.nn.softmax(
        (teacher_output.astype(jnp.float32) - center) / temp, axis=-1)
    teacher_chunks = jnp.split(teacher_soft, 2, axis=0)
    total, n_terms = 0.0, 0
    for iq, q in enumerate(teacher_chunks):
        for v in range(len(student_chunks)):
            if v == iq:
                continue
            loss = jnp.sum(-q * jax.nn.log_softmax(student_chunks[v], axis=-1),
                           axis=-1)
            total = total + jnp.mean(loss)
            n_terms += 1
    return total / n_terms


if __name__ == "__main__":
    # small, module-consistent shapes
    out_dim = 128          # args.out_dim (small for the demo)
    ncrops = 4             # 2 global + 2 local crops
    B = 8                  # batch per crop
    warmup_teacher_temp, teacher_temp = 0.04, 0.07
    warmup_epochs, nepochs = 3, 10
    epoch = 1

    key = jax.random.PRNGKey(0)
    k1, k2 = jax.random.split(key)
    student_output = jax.random.normal(k1, (ncrops * B, out_dim), jnp.float32)
    teacher_output = jax.random.normal(k2, (2 * B, out_dim), jnp.float32)

    dino = DINOLossPallas(out_dim, ncrops, warmup_teacher_temp, teacher_temp,
                          warmup_epochs, nepochs)
    center_before = dino.center

    loss = dino(student_output, teacher_output, epoch)
    loss = jax.block_until_ready(loss)
    new_center = jax.block_until_ready(dino.center)

    # correctness check vs. pure-JAX reference
    temp = float(dino.teacher_temp_schedule[epoch])
    loss_ref = reference_dino_loss(student_output, teacher_output,
                                   center_before, temp, 0.1, ncrops)
    center_ref = (center_before * 0.9 +
                  jnp.sum(teacher_output, axis=0, keepdims=True)
                  / teacher_output.shape[0] * 0.1)
    assert jnp.allclose(loss, loss_ref, rtol=1e-4, atol=1e-4), (loss, loss_ref)
    assert jnp.allclose(new_center, center_ref, rtol=1e-5, atol=1e-5)

    print("KERNEL_OK")
</pallas_src>

<mosaic_0001>
module attributes {stable_mosaic.version = 11 : i64} {
  func.func @_dino_kernel(%arg0: i32, %arg1: i32, %arg2: memref<2xf32, #tpu.memory_space<smem>>, %arg3: memref<2x8x128xf32, #tpu.memory_space<vmem>>, %arg4: memref<1x8x128xf32, #tpu.memory_space<vmem>>, %arg5: memref<1x128xf32, #tpu.memory_space<vmem>>, %arg6: memref<1x1x1xf32, #tpu.memory_space<vmem>>, %arg7: memref<1x1x128xf32, #tpu.memory_space<vmem>>, %arg8: memref<2x8x128xf32, #tpu.memory_space<vmem>>) attributes {dimension_semantics = [#tpu.dimension_semantics<parallel>, #tpu.dimension_semantics<arbitrary>], iteration_bounds = array<i64: 1, 4>, scalar_prefetch = 0 : i64, scratch_operands = 1 : i64, tpu.core_type = #tpu.core_type<tc>, window_params = [{transform_indices = @transform_0, window_bounds = array<i64: 2>}, {transform_indices = @transform_1, window_bounds = array<i64: 2, 8, 128>}, {transform_indices = @transform_2, window_bounds = array<i64: 1, 8, 128>}, {pipeline_mode = #tpu.pipeline_mode<synchronous>, transform_indices = @transform_3, window_bounds = array<i64: 1, 128>}, {transform_indices = @transform_4, window_bounds = array<i64: 1, 1, 1>}, {transform_indices = @transform_5, window_bounds = array<i64: 1, 1, 128>}]} {
    %c0 = arith.constant 0 : index
    %0 = memref.load %arg2[%c0] : memref<2xf32, #tpu.memory_space<smem>>
    %c1 = arith.constant 1 : index
    %1 = memref.load %arg2[%c1] : memref<2xf32, #tpu.memory_space<smem>>
    %c0_i32 = arith.constant 0 : i32
    %2 = arith.cmpi eq, %arg1, %c0_i32 : i32
    %3 = arith.extui %2 : i1 to i32
    %c0_i32_0 = arith.constant 0 : i32
    %4 = arith.cmpi ne, %3, %c0_i32_0 : i32
    scf.if %4 {
      %cst_8 = arith.constant 0.000000e+00 : f32
      %23 = vector.broadcast %cst_8 : f32 to vector<1x1x1xf32>
      %c0_9 = arith.constant 0 : index
      %c0_10 = arith.constant 0 : index
      %c0_11 = arith.constant 0 : index
      %24 = vector.load %arg6[%c0_9, %c0_10, %c0_11] : memref<1x1x1xf32, #tpu.memory_space<vmem>>, vector<1x1x1xf32>
      tpu.vector_store %arg6[%c0_9, %c0_10, %c0_11], %23 {strides = array<i32>} : memref<1x1x1xf32, #tpu.memory_space<vmem>>, vector<1x1x1xf32>,
      %c0_12 = arith.constant 0 : index
      %c0_13 = arith.constant 0 : index
      %c0_14 = arith.constant 0 : index
      %25 = vector.load %arg3[%c0_12, %c0_13, %c0_14] : memref<2x8x128xf32, #tpu.memory_space<vmem>>, vector<2x8x128xf32>
      %cst_15 = arith.constant dense<0.000000e+00> : vector<2x128xf32>
      %26 = vector.multi_reduction <add>, %25, %cst_15 [1] : vector<2x8x128xf32> to vector<2x128xf32>
      %27 = vector.shape_cast %26 : vector<2x128xf32> to vector<2x1x128xf32>
      %cst_16 = arith.constant dense<0.000000e+00> : vector<1x128xf32>
      %28 = vector.multi_reduction <add>, %27, %cst_16 [0] : vector<2x1x128xf32> to vector<1x128xf32>
      %29 = vector.shape_cast %28 : vector<1x128xf32> to vector<1x1x128xf32>
      %c0_17 = arith.constant 0 : index
      %c0_18 = arith.constant 0 : index
      %c0_19 = arith.constant 0 : index
      %30 = vector.load %arg7[%c0_17, %c0_18, %c0_19] : memref<1x1x128xf32, #tpu.memory_space<vmem>>, vector<1x1x128xf32>
      tpu.vector_store %arg7[%c0_17, %c0_18, %c0_19], %29 {strides = array<i32>} : memref<1x1x128xf32, #tpu.memory_space<vmem>>, vector<1x1x128xf32>,
      %c0_20 = arith.constant 0 : index
      %c0_21 = arith.constant 0 : index
      %31 = vector.load %arg5[%c0_20, %c0_21] : memref<1x128xf32, #tpu.memory_space<vmem>>, vector<1x128xf32>
      %32 = vector.shape_cast %31 : vector<1x128xf32> to vector<1x1x128xf32>
      %33 = vector.broadcast %32 : vector<1x1x128xf32> to vector<2x8x128xf32>
      %34 = arith.subf %25, %33 : vector<2x8x128xf32>
      %35 = vector.broadcast %0 : f32 to vector<2x8x128xf32>
      %36 = arith.mulf %34, %35 : vector<2x8x128xf32>
      %cst_22 = arith.constant dense<0xFF800000> : vector<2x8xf32>
      %37 = vector.multi_reduction <maximumf>, %36, %cst_22 [2] : vector<2x8x128xf32> to vector<2x8xf32>
      %38 = vector.shape_cast %37 : vector<2x8xf32> to vector<2x8x1xf32>
      %39 = vector.broadcast %38 : vector<2x8x1xf32> to vector<2x8x128xf32>
      %40 = arith.subf %36, %39 : vector<2x8x128xf32>
      %41 = math.exp %40 : vector<2x8x128xf32>
      %cst_23 = arith.constant dense<0.000000e+00> : vector<2x8xf32>
      %42 = vector.multi_reduction <add>, %41, %cst_23 [2] : vector<2x8x128xf32> to vector<2x8xf32>
      %43 = vector.shape_cast %42 : vector<2x8xf32> to vector<2x8x1xf32>
      %44 = tpu.reciprocal %43 : vector<2x8x1xf32> -> vector<2x8x1xf32>
      %45 = vector.broadcast %44 : vector<2x8x1xf32> to vector<2x8x128xf32>
      %46 = arith.mulf %41, %45 : vector<2x8x128xf32>
      %c0_24 = arith.constant 0 : index
      %c0_25 = arith.constant 0 : index
      %c0_26 = arith.constant 0 : index
      %47 = vector.load %arg8[%c0_24, %c0_25, %c0_26] : memref<2x8x128xf32, #tpu.memory_space<vmem>>, vector<2x8x128xf32>
      tpu.vector_store %arg8[%c0_24, %c0_25, %c0_26], %46 {strides = array<i32>} : memref<2x8x128xf32, #tpu.memory_space<vmem>>, vector<2x8x128xf32>,
    } else {
    }
    %c0_1 = arith.constant 0 : index
    %c0_2 = arith.constant 0 : index
    %c0_3 = arith.constant 0 : index
    %5 = vector.load %arg4[%c0_1, %c0_2, %c0_3] : memref<1x8x128xf32, #tpu.memory_space<vmem>>, vector<1x8x128xf32>
    %6 = vector.shape_cast %5 : vector<1x8x128xf32> to vector<8x128xf32>
    %7 = vector.broadcast %1 : f32 to vector<8x128xf32>
    %8 = arith.mulf %6, %7 : vector<8x128xf32>
    %cst = arith.constant dense<0xFF800000> : vector<8xf32>
    %9 = vector.multi_reduction <maximumf>, %8, %cst [1] : vector<8x128xf32> to vector<8xf32>
    %10 = vector.shape_cast %9 : vector<8xf32> to vector<8x1xf32>
    %11 = vector.broadcast %10 : vector<8x1xf32> to vector<8x128xf32>
    %12 = arith.subf %8, %11 : vector<8x128xf32>
    %13 = math.exp %12 : vector<8x128xf32>
    %cst_4 = arith.constant dense<0.000000e+00> : vector<8xf32>
    %14 = vector.multi_reduction <add>, %13, %cst_4 [1] : vector<8x128xf32> to vector<8xf32>
    %15 = vector.shape_cast %14 : vector<8xf32> to vector<8x1xf32>
    %16 = math.log %15 : vector<8x1xf32>
    %c0_i32_5 = arith.constant 0 : i32
    %17 = arith.cmpi ne, %arg1, %c0_i32_5 : i32
    %18 = arith.extui %17 : i1 to i32
    %c0_i32_6 = arith.constant 0 : i32
    %19 = arith.cmpi ne, %18, %c0_i32_6 : i32
    scf.if %19 {
      %c0_8 = arith.constant 0 : index
      %c0_9 = arith.constant 0 : index
      %c0_10 = arith.constant 0 : index
      %23 = vector.load %arg8[%c0_8, %c0_9, %c0_10] : memref<2x8x128xf32, #tpu.memory_space<vmem>>, vector<1x8x128xf32>
      %24 = vector.shape_cast %23 : vector<1x8x128xf32> to vector<8x128xf32>
      %25 = arith.mulf %24, %12 : vector<8x128xf32>
      %cst_11 = arith.constant dense<0.000000e+00> : vector<8xf32>
      %26 = vector.multi_reduction <add>, %25, %cst_11 [1] : vector<8x128xf32> to vector<8xf32>
      %27 = vector.shape_cast %26 : vector<8xf32> to vector<8x1xf32>
      %28 = arith.subf %16, %27 : vector<8x1xf32>
      %c0_12 = arith.constant 0 : index
      %c0_13 = arith.constant 0 : index
      %c0_14 = arith.constant 0 : index
      %29 = vector.load %arg6[%c0_12, %c0_13, %c0_14] : memref<1x1x1xf32, #tpu.memory_space<vmem>>, vector<1x1x1xf32>
      %cst_15 = arith.constant dense<0.000000e+00> : vector<1xf32>
      %30 = vector.multi_reduction <add>, %28, %cst_15 [0] : vector<8x1xf32> to vector<1xf32>
      %31 = vector.shape_cast %30 : vector<1xf32> to vector<1x1xf32>
      %32 = vector.shape_cast %31 : vector<1x1xf32> to vector<1x1x1xf32>
      %33 = arith.addf %29, %32 : vector<1x1x1xf32>
      %c0_16 = arith.constant 0 : index
      %c0_17 = arith.constant 0 : index
      %c0_18 = arith.constant 0 : index
      %34 = vector.load %arg6[%c0_16, %c0_17, %c0_18] : memref<1x1x1xf32, #tpu.memory_space<vmem>>, vector<1x1x1xf32>
      tpu.vector_store %arg6[%c0_16, %c0_17, %c0_18], %33 {strides = array<i32>} : memref<1x1x1xf32, #tpu.memory_space<vmem>>, vector<1x1x1xf32>,
    } else {
    }
    %c1_i32 = arith.constant 1 : i32
    %20 = arith.cmpi ne, %arg1, %c1_i32 : i32
    %21 = arith.extui %20 : i1 to i32
    %c0_i32_7 = arith.constant 0 : i32
    %22 = arith.cmpi ne, %21, %c0_i32_7 : i32
    scf.if %22 {
      %c1_8 = arith.constant 1 : index
      %c0_9 = arith.constant 0 : index
      %c0_10 = arith.constant 0 : index
      %23 = vector.load %arg8[%c1_8, %c0_9, %c0_10] : memref<2x8x128xf32, #tpu.memory_space<vmem>>, vector<1x8x128xf32>
      %24 = vector.shape_cast %23 : vector<1x8x128xf32> to vector<8x128xf32>
      %25 = arith.mulf %24, %12 : vector<8x128xf32>
      %cst_11 = arith.constant dense<0.000000e+00> : vector<8xf32>
      %26 = vector.multi_reduction <add>, %25, %cst_11 [1] : vector<8x128xf32> to vector<8xf32>
      %27 = vector.shape_cast %26 : vector<8xf32> to vector<8x1xf32>
      %28 = arith.subf %16, %27 : vector<8x1xf32>
      %c0_12 = arith.constant 0 : index
      %c0_13 = arith.constant 0 : index
      %c0_14 = arith.constant 0 : index
      %29 = vector.load %arg6[%c0_12, %c0_13, %c0_14] : memref<1x1x1xf32, #tpu.memory_space<vmem>>, vector<1x1x1xf32>
      %cst_15 = arith.constant dense<0.000000e+00> : vector<1xf32>
      %30 = vector.multi_reduction <add>, %28, %cst_15 [0] : vector<8x1xf32> to vector<1xf32>
      %31 = vector.shape_cast %30 : vector<1xf32> to vector<1x1xf32>
      %32 = vector.shape_cast %31 : vector<1x1xf32> to vector<1x1x1xf32>
      %33 = arith.addf %29, %32 : vector<1x1x1xf32>
      %c0_16 = arith.constant 0 : index
      %c0_17 = arith.constant 0 : index
      %c0_18 = arith.constant 0 : index
      %34 = vector.load %arg6[%c0_16, %c0_17, %c0_18] : memref<1x1x1xf32, #tpu.memory_space<vmem>>, vector<1x1x1xf32>
      tpu.vector_store %arg6[%c0_16, %c0_17, %c0_18], %33 {strides = array<i32>} : memref<1x1x1xf32, #tpu.memory_space<vmem>>, vector<1x1x1xf32>,
    } else {
    }
    return
  }
  func.func @transform_0(%arg0: i32, %arg1: i32) -> i32 {
    %c0_i32 = arith.constant 0 : i32
    %c0_i32_0 = arith.constant 0 : i32
    return %c0_i32 : i32
  }
  func.func @transform_1(%arg0: i32, %arg1: i32) -> (i32, i32, i32) {
    %c0_i32 = arith.constant 0 : i32
    %c0_i32_0 = arith.constant 0 : i32
    %c0_i32_1 = arith.constant 0 : i32
    return %c0_i32, %arg0, %c0_i32_0 : i32, i32, i32
  }
  func.func @transform_2(%arg0: i32, %arg1: i32) -> (i32, i32, i32) {
    %c0_i32 = arith.constant 0 : i32
    %c0_i32_0 = arith.constant 0 : i32
    return %arg1, %arg0, %c0_i32 : i32, i32, i32
  }
  func.func @transform_3(%arg0: i32, %arg1: i32) -> (i32, i32) {
    %c0_i32 = arith.constant 0 : i32
    %c0_i32_0 = arith.constant 0 : i32
    %c0_i32_1 = arith.constant 0 : i32
    return %c0_i32, %c0_i32_0 : i32, i32
  }
  func.func @transform_4(%arg0: i32, %arg1: i32) -> (i32, i32, i32) {
    %c0_i32 = arith.constant 0 : i32
    %c0_i32_0 = arith.constant 0 : i32
    %c0_i32_1 = arith.constant 0 : i32
    return %arg0, %c0_i32, %c0_i32_0 : i32, i32, i32
  }
  func.func @transform_5(%arg0: i32, %arg1: i32) -> (i32, i32, i32) {
    %c0_i32 = arith.constant 0 : i32
    %c0_i32_0 = arith.constant 0 : i32
    %c0_i32_1 = arith.constant 0 : i32
    return %arg0, %c0_i32, %c0_i32_0 : i32, i32, i32
  }
}

</mosaic_0001>

<bundles_post_ra>
// kernel: _dino_forward.1
= control target key start
LH: loop header
LB: loop body
LE: loop exit
PB: predicated region body
PF: predicated region fallthrough
CT: control target
= control target key end

     0   :  { %11 = vsyncpa [#allocation6], 0  ;;  %s1007_s0 = inlined_call_operand.vmem [shape: f32[2], index: 0, kind: input, shape index: {}]   ;;  %s1008_s1 = inlined_call_operand.hbm [shape: f32[2,8,128], index: 1, kind: input, shape index: {}]   ;;  %s1009_s2 = inlined_call_operand.hbm [shape: f32[4,8,128], index: 2, kind: input, shape index: {}]   ;;  %s1010_s3 = inlined_call_operand.vmem [shape: f32[1,128], index: 3, kind: input, shape index: {}]   ;;  %s1011_s4 = inlined_call_operand.hbm [shape: f32[1,1,1], index: 4, kind: output, shape index: {0}]   ;;  %s1012_s5 = inlined_call_operand.vmem [shape: f32[1,1,128], index: 5, kind: output, shape index: {1}]  }
   0x1   :  { %12 = vsyncpa [#allocation4], 0 }
   0x2   :  { %13 = vsyncpa [#allocation9], 0 }
   0x3   :  { %15 = vsyncpa [#allocation9 + $0x1], 0 }
   0x4   :  { %16 = vsyncpa [#allocation5], 0  ;;  %s868_s18 = smov 0   ;;  %s870_s19 = smov 0  }
   0x5   :  { %s872_s20 = smov 0   ;;  %s874_s21 = smov 0  }
   0x6   :  { %s876_s22 = smov 0   ;;  %s878_s23 = smov 0  }
   0x7 LB: > { %s546_s24 = sadd.s32 4294967295, %s830_s23   ;;  %p103_p0 = scmp.ne.s32.totalorder %s814_s19, %s810_s18  ;;  %s830_s23 = sphi %s878_s23, %s22_s23   ;;  %s826_s22 = sphi %s876_s22, %s1021_s22   ;;  %s822_s21 = sphi %s874_s21, %s1020_s21   ;;  %s818_s20 = sphi %s872_s20, %s1019_s20   ;;  %s814_s19 = sphi %s870_s19, %s1018_s19   ;;  %s810_s18 = sphi %s868_s18, %s1017_s18  }
   0x8   : > { %p900_p1 = scmp.eq.s32.totalorder %s546_s24, 0  ;;  %p547_p2 = scmp.ge.s32.totalorder %s830_s23, 1 }
   0x9   : > { %p187_p3 = scmp.lt.s32.totalorder %s830_s23, 5  ;;  %s199_s29 = sshll.u32 %s1007_s0, 4  ;;  %s200_s29 = int_to_ptr.vmem [resolvable:$true] %s199_s29 }
   0xa   : > { %p908_p4 = por %p900_p1, %p103_p0  ;;  %s210_s8 = sshll.u32 %s1008_s1, 4  ;;  %s211_s8 = int_to_ptr.hbm [resolvable:$true] %s210_s8 }
   0xb   : > { %p915_p5 = pnand %p547_p2, %p187_p3  ;;  %s832_s9 = smov [#allocation7]  }
   0xc   : > { %s212_s10 = sshll.u32 %s832_s9, 4  ;;  %s833_s11 = smov [#allocation3]   ;;  %s213_s10 = int_to_ptr.vmem [resolvable:$true] %s212_s10 }
   0xd   : > { %p580_p6 = pneg %p915_p5  ;;  %s834_s12 = smov 128  }
   0xe   : > { %s835_s13 = smov 8   ;;  %s31_s14 = sadd.s32 1, %s826_s22 }
   0xf   : > { %p581_p7 = pnand %p580_p6, %p900_p1  ;;  %s90_s15 = sadd.s32 1, %s818_s20 }
  0x10   : > { %p32_p8 = scmp.ge.s32.totalorder %s31_s14, 4  ;;  %p97_p9 = scmp.ne.s32.totalorder %s818_s20, %s814_s19 }
  0x11   : > { %583 = dma.vmem_to_smem (!%p581_p7), %s200_s29, 16, %s833_s11, [#allocation6]  }
  0x12   : > { %586 = dma.hbm_to_vmem [thread:$0]  (!%p581_p7), %s211_s8, 256, %s213_s10, [#allocation4], %s834_s12, %s834_s12, %s835_s13  }
  0x13   : > { %p98_p10 = scmp.eq.s32.totalorder %s830_s23, 0  ;;  %p593_p11 = scmp.lt.s32.totalorder %s830_s23, 4 }
  0x14   : > { %s1023_s14 = smov (%p32_p8, %s31_s14), 0  ;;  %s229_s17 = sand.u32 1, %s818_s20  }
  0x15   : > { %p934_p12 = por %p98_p10, %p97_p9  ;;  %s85_s18 = ssub.s32 %s826_s22, %s1023_s14 }
  0x16   : > { %p88_p13 = scmp.eq.s32.totalorder %s85_s18, 0  ;;  %s551_s27 = sshll.u32 %s229_s17, 3 }
  0x17   : > { %s552_s28 = sshll.u32 %s826_s22, 3  ;;  %s233_s9 = scalar_lea.vmem [#allocation8], %s551_s27 }
  0x18   : > { %s943_s29 = scalar_select %p88_p13, %s818_s20, %s90_s15  }
  0x19   : > { %s238_s8 = scalar_lea.hbm %s1009_s2, %s552_s28  ;;  %s242_s10 = sshll.u32 %s233_s9, 4  ;;  %s243_s10 = int_to_ptr.vmem [resolvable:$true] %s242_s10 }
  0x1a   : > { %s240_s11 = sshll.u32 %s238_s8, 4  ;;  %p588_p0 = pnand %p593_p11, %p934_p12  ;;  %s241_s11 = int_to_ptr.hbm [resolvable:$true] %s240_s11 }
  0x1b   : > { %s230_s12 = scalar_lea.sflag [#allocation9], %s229_s17  ;;  %251 = sbr.rel (%p915_p5) target bundleno = 863 (0x35f), region = 36 }
  0x1c   : > { %590 = dma.hbm_to_vmem [thread:$0]  (!%p588_p0), %s241_s11, 128, %s243_s10, %s230_s12  }
  0x20   : > { %793 = dma.done.wait (%p900_p1), [#allocation6], 16  }
  0x21   : > { %795 = vsyncadd (%p900_p1), [#allocation6], 4294967280 }
  0x22   : > { %797 = dma.done.wait (%p900_p1), [#allocation4], 256  }
  0x23   : > { %799 = vsyncadd (%p900_p1), [#allocation4], 4294967040  ;;  %s263_s13 = sand.u32 1, %s814_s19  }
  0x24   : > { %s963_s15 = sshll.u32 %s263_s13, 3  ;;  %s264_s30 = scalar_lea.sflag [#allocation9], %s263_s13 }
  0x25   : > { %s267_s16 = scalar_lea.vmem [#allocation8], %s963_s15 }
  0x26   : > { %801 = dma.done.wait (%p908_p4), %s264_s30, 128  }
  0x27   : > { %803 = vsyncadd (%p908_p4), %s264_s30, 4294967168 }
  0x28   : > { %273 = sfence }
  0x29   : > { %s297_s17 = sld [smem:[#allocation3]]  ;;  %p558_p2 = scmp.ne.s32.totalorder %s822_s21, 0 }
  0x2a   : > { %s970_s18 = sld [smem:[#allocation3 + $0x1]] }
  0x2b   : > { %302 = sbr.rel (%p558_p2) target bundleno = 324 (0x144), region = 52 }
  0x30   : > { %v305_v0 = vld [vmem:[#allocation7] sm:$0xff]  ;;  %v652_v1 = vld [vmem:[%s1010_s3] ss:$0 sm:$0xff]  ;;  %v327_v2 = vstv %s297_s17  ;;  %v306_v4 = vld [vmem:[#allocation7 + $0x8] sm:$0xff]  ;;  %vm303_vm0 = vcmask 0   ;;  %v836_v29 = vmov 0.0  }
  0x31   : > { %v307_v3 = vrot.slane %v305_v0, 4  ;;  %v325_v5 = vsub.f32 %v305_v0, %v652_v1  ;;  %v313_v6 = vrot.slane %v306_v4, 4  ;;  %v326_v12 = vsub.f32 %v306_v4, %v652_v1  ;;  %304 = vst.msk [vmem:[#allocation10] sm:$0x1] %vm303_vm0, %v836_v29 }
  0x33   : > { %v308_v7 = vadd.f32 %v307_v3, %v305_v0  ;;  %v328_v8 = vmul.f32 %v327_v2, %v325_v5  ;;  %v314_v9 = vadd.f32 %v313_v6, %v306_v4  ;;  %v329_v17 = vmul.f32 %v327_v2, %v326_v12 }
  0x35   : > { %v309_v10 = vrot.slane %v308_v7, 2  ;;  %330 = vmax.xlane.f32.xlu0 %v328_v8  ;;  %v315_v11 = vrot.slane %v314_v9, 2 }
  0x37   : > { %v310_v13 = vadd.f32 %v309_v10, %v308_v7  ;;  %v316_v14 = vadd.f32 %v315_v11, %v314_v9 }
  0x39   : > { %v311_v15 = vrot.slane %v310_v13, 1  ;;  %v317_v16 = vrot.slane %v316_v14, 1 }
  0x3b   : > { %v312_v18 = vadd.f32 %v311_v15, %v310_v13  ;;  %v318_v19 = vadd.f32 %v317_v16, %v316_v14 }
  0x3d   : > { %332 = vmax.xlane.f32.xlu0 %v329_v17  ;;  %v319_v20 = vadd.f32 %v318_v19, %v312_v18 }
  0x3f   : > { %320 = vst [vmem:[%s1012_s5] sm:$0x1] %v319_v20 }
  0xa8   : > { %v331_v21 = vpop.xlane.xlu0 %330 }
  0xa9   : > { %v334_v22 = vsub.f32 %v328_v8, %v331_v21 }
  0xab   : > { %v336_v23 = vmul.f32 1.442695, %v334_v22 }
  0xad   : > { %653 = vpow2.f32 %v336_v23 }
  0xb0   : > { %v333_v24 = vpop.xlane.xlu0 %332 }
  0xb1   : > { %v335_v25 = vsub.f32 %v329_v17, %v333_v24 }
  0xb3   : > { %v654_v26 = vpop.eup %653  ;;  %v338_v27 = vmul.f32 1.442695, %v335_v25 }
  0xb4   : > { %340 = vadd.xlane.f32.xlu1 %v654_v26 }
  0xb5   : > { %655 = vpow2.f32 %v338_v27 }
  0xbb   : > { %v656_v28 = vpop.eup %655 }
  0xbc   : > { %342 = vadd.xlane.f32.xlu1 %v656_v28 }
 0x127   : > { %v341_v30 = vpop.xlane.xlu1 %340 }
 0x128   : > { %657 = vrcp.f32 %v341_v30  ;;  %v355_v35 = vand.u32 2147483648, %v341_v30  ;;  %v353_v37 = vand.u32 2147483647, %v341_v30  ;;  %vm349_vm2 = vweird.f32 %v341_v30 }
 0x12a   : > { %v356_v40 = vor.u32 1.1754944e-38, %v355_v35  ;;  %vm354_vm4 = vcmp.eq.f32.partialorder %v353_v37, 8.507059e+37 }
 0x12e   : > { %v658_v31 = vpop.eup %657 }
 0x12f   : > { %v345_v32 = vmul.f32 %v658_v31, %v341_v30  ;;  %v343_v33 = vpop.xlane.xlu1 %342  ;;  %vm350_vm1 = vweird.f32 %v658_v31 }
 0x130   : > { %659 = vrcp.f32 %v343_v33  ;;  %vm351_vm3 = vmor %vm349_vm2, %vm350_vm1  ;;  %v369_v46 = vand.u32 2147483648, %v343_v33  ;;  %v367_v48 = vand.u32 2147483647, %v343_v33  ;;  %vm363_vm6 = vweird.f32 %v343_v33 }
 0x131   : > { %v346_v34 = vsub.f32 1.0, %v345_v32 }
 0x132   : > { %v370_v50 = vor.u32 1.1754944e-38, %v369_v46  ;;  %vm368_vm8 = vcmp.eq.f32.partialorder %v367_v48, 8.507059e+37 }
 0x133   : > { %v347_v36 = vmul.f32 %v658_v31, %v346_v34 }
 0x135   : > { %v348_v38 = vadd.f32 %v658_v31, %v347_v36 }
 0x136   : > { %v660_v39 = vpop.eup %659 }
 0x137   : > { %v352_v41 = vsel %vm351_vm3, %v658_v31, %v348_v38  ;;  %v359_v42 = vmul.f32 %v660_v39, %v343_v33  ;;  %vm364_vm5 = vweird.f32 %v660_v39 }
 0x138   : > { %v357_v43 = vsel %vm354_vm4, %v356_v40, %v352_v41  ;;  %vm365_vm7 = vmor %vm363_vm6, %vm364_vm5 }
 0x139   : > { %v372_v44 = vmul.f32 %v654_v26, %v357_v43  ;;  %v360_v45 = vsub.f32 1.0, %v359_v42 }
 0x13b   : > { %374 = vst [vmem:[#allocation2] sm:$0xff] %v372_v44  ;;  %v361_v47 = vmul.f32 %v660_v39, %v360_v45 }
 0x13d   : > { %v362_v49 = vadd.f32 %v660_v39, %v361_v47 }
 0x13f   : > { %v366_v51 = vsel %vm365_vm7, %v660_v39, %v362_v49 }
 0x140   : > { %v371_v52 = vsel %vm368_vm8, %v370_v50, %v366_v51 }
 0x141   : > { %v373_v53 = vmul.f32 %v656_v28, %v371_v52 }
 0x143   : > { %375 = vst [vmem:[#allocation2 + $0x8] sm:$0xff] %v373_v53 }
 0x144 PF: > { %v376_v54 = vld [vmem:[%s267_s16] sm:$0xff]  ;;  %v377_v55 = vstv %s970_s18  ;;  %p559_p1 = scmp.eq.s32.totalorder %s822_s21, 0 }
 0x145   : > { %v378_v56 = vmul.f32 %v377_v55, %v376_v54 }
 0x147   : > { %379 = vmax.xlane.f32.xlu0 %v378_v56 }
 0x1ba   : > { %v380_v57 = vpop.xlane.xlu0 %379 }
 0x1bb   : > { %v381_v58 = vsub.f32 %v378_v56, %v380_v57 }
 0x1bd   : > { %v382_v59 = vmul.f32 1.442695, %v381_v58 }
 0x1bf   : > { %661 = vpow2.f32 %v382_v59 }
 0x1c5   : > { %v662_v60 = vpop.eup %661 }
 0x1c6   : > { %384 = vadd.xlane.f32.xlu0 %v662_v60 }
 0x239   : > { %v385_v61 = vpop.xlane.xlu0 %384 }
 0x23a   : > { %663 = vlog2.f32 %v385_v61 }
 0x23d   : > { %391 = sbr.rel (%p559_p1) target bundleno = 714 (0x2ca), region = 56 }
 0x240   : > { %v664_v62 = vpop.eup %663 }
 0x241   : > { %v387_v63 = vmul.f32 0.6931472, %v664_v62 }
 0x242   : > { %v392_v0 = vld [vmem:[#allocation2] sm:$0xff]  ;;  %v397_v9 = vld [vmem:[#allocation10] sm:$0x1]  ;;  %vm405_vm9 = vcmask 0  }
 0x243   : > { %v393_v1 = vmul.f32 %v392_v0, %v381_v58 }
 0x245   : > { %394 = vadd.xlane.f32.xlu0 %v393_v1 }
 0x2b8   : > { %v395_v2 = vpop.xlane.xlu0 %394 }
 0x2b9   : > { %v396_v3 = vsub.f32 %v387_v63, %v395_v2 }
 0x2bb   : > { %v398_v4 = vrot.slane %v396_v3, 4 }
 0x2bd   : > { %v399_v5 = vadd.f32 %v398_v4, %v396_v3 }
 0x2bf   : > { %v400_v6 = vrot.slane %v399_v5, 2 }
 0x2c1   : > { %v401_v7 = vadd.f32 %v400_v6, %v399_v5 }
 0x2c3   : > { %v402_v8 = vrot.slane %v401_v7, 1 }
 0x2c5   : > { %v403_v10 = vadd.f32 %v402_v8, %v401_v7 }
 0x2c7   : > { %v404_v11 = vadd.f32 %v403_v10, %v397_v9 }
 0x2c9   : > { %406 = vst.msk [vmem:[#allocation10] sm:$0x1] %vm405_vm9, %v404_v11 }
 0x2ca PF: > { %p560_p3 = scmp.eq.s32.totalorder %s822_s21, 1 }
 0x2cc   : > { %410 = sbr.rel (%p560_p3) target bundleno = 857 (0x359), region = 60 }
 0x2d1   : > { %v412_v12 = vld [vmem:[#allocation2 + $0x8] sm:$0xff]  ;;  %v417_v21 = vld [vmem:[#allocation10] sm:$0x1]  ;;  %vm425_vm10 = vcmask 0  }
 0x2d2   : > { %v413_v13 = vmul.f32 %v412_v12, %v381_v58 }
 0x2d4   : > { %414 = vadd.xlane.f32.xlu0 %v413_v13 }
 0x347   : > { %v415_v14 = vpop.xlane.xlu0 %414 }
 0x348   : > { %v416_v15 = vsub.f32 %v387_v63, %v415_v14 }
 0x34a   : > { %v418_v16 = vrot.slane %v416_v15, 4 }
 0x34c   : > { %v419_v17 = vadd.f32 %v418_v16, %v416_v15 }
 0x34e   : > { %v420_v18 = vrot.slane %v419_v17, 2 }
 0x350   : > { %v421_v19 = vadd.f32 %v420_v18, %v419_v17 }
 0x352   : > { %v422_v20 = vrot.slane %v421_v19, 1 }
 0x354   : > { %v423_v22 = vadd.f32 %v422_v20, %v421_v19 }
 0x356   : > { %v424_v23 = vadd.f32 %v423_v22, %v417_v21 }
 0x358   : > { %426 = vst.msk [vmem:[#allocation10] sm:$0x1] %vm425_vm10, %v424_v23 }
 0x359 PF: > { %p596_p4 = scmp.eq.s32.totalorder %s546_s24, 3  ;;  %s439_s7 = sshll.u32 %s1011_s4, 4  ;;  %s440_s7 = int_to_ptr.hbm [resolvable:$true] %s439_s7 }
 0x35a   : > { %s837_s8 = smov [#allocation10]  }
 0x35b   : > { %s437_s9 = sshll.u32 %s837_s8, 4  ;;  %s438_s9 = int_to_ptr.vmem [resolvable:$true] %s437_s9 }
 0x35c   : > { %577 = dma.vmem_to_hbm [thread:$0]  (%p596_p4), %s438_s9, 16, %s440_s7, [#allocation5]  }
 0x35d   : > { %805 = dma.done.wait (%p596_p4), [#allocation5], 16  }
 0x35e   : > { %807 = vsyncadd (%p596_p4), [#allocation5], 4294967280 }
 0x35f PF: > { %s22_s23 = sadd.s32 1, %s830_s23   ;;  %s1017_s18 = smov %s814_s19 }
 0x360   : > { %p19_p5 = scmp.ge.s32.totalorder %s22_s23, 6   ;;  %s1018_s19 = smov %s818_s20 }
 0x361   : > { %s1019_s20 = smov %s943_s29  ;;  %s1020_s21 = smov %s826_s22 }
 0x362   : > { %s1021_s22 = smov %s1023_s14  ;;  %21 = sbr.rel (!%p19_p5) target bundleno = 7 (0x7), region = 110 }
 0x367   :  { %462 = vsyncpa [#allocation4], 1 }
 0x368   :  { %464 = vsyncpa [#allocation4 + $0x1], 1 }
 0x369   :  { %465 = vsyncpa [#allocation9], 1 }
 0x36a   :  { %467 = vsyncpa [#allocation9 + $0x1], 1 }
 0x36b   :  { %468 = vsyncpa [#allocation5], 1 }
 0x36c   :  { %470 = vsyncpa [#allocation5 + $0x1], 1 }
 0x36d   :  { %471 = vsyncpa [#allocation6], 1 }
 0x36e   :  { %473 = vsyncpa [#allocation6 + $0x1], 1 }

</bundles_post_ra>
